<compile_context>
chip_gen: v7x
topology: tpu7x:2x2x1
jax: 0.10.0
libtpu: 0.0.40
codegen_flags: <defaults>
</compile_context>

<pallas_src>
import jax
import jax.numpy as jnp
from jax.experimental import pallas as pl
from jax.experimental.pallas import tpu as pltpu

LEAKY_SLOPE = 0.01
NEG_FILL = -1e30  # bias for padded logit lanes; exp() underflows to exactly 0.0


def _leaky_relu(x):
    return jnp.where(x > 0, x, LEAKY_SLOPE * x)


def _rnn_cell(ids, emb, hidden, w_emb, w_hid, b_fused, hidden_dim):
    """One RNN-cell step on in-VMEM values.

    ids:     (B, 1) int32 token ids
    emb:     (Vp, E)      zero-padded embedding table
    hidden:  (B, H)
    w_emb:   (E, H+Opad)  top rows of fused [W_i2h^T | W_i2o^T_pad]
    w_hid:   (H, H+Opad)  bottom rows of the fused weight
    b_fused: (1, H+Opad)  = [b_i2h | b_i2o | NEG_FILL...]
    returns  (logp_padded (B, Opad), new_hidden (B, H))
    """
    # TODO(synk): nn.Dropout(p=0.22) treated as identity (eval/inference mode).
    B = ids.shape[0]
    Vp = emb.shape[0]

    # Embedding gather as an exact one-hot matmul on the MXU.
    iota = jax.lax.broadcasted_iota(jnp.int32, (B, Vp), 1)
    onehot = (iota == ids).astype(jnp.float32)                           # (B, Vp)
    embeds = jnp.dot(onehot, emb, preferred_element_type=jnp.float32)    # (B, E)

    # LeakyReLU on the two halves separately == leaky_relu(cat([e, h], 1)).
    e = _leaky_relu(embeds)
    h = _leaky_relu(hidden)

    # Fused split-K matmul: [e | h] @ [[w_emb], [w_hid]] + b -> (B, H + Opad).
    acc = jnp.dot(e, w_emb, preferred_element_type=jnp.float32)
    acc = acc + jnp.dot(h, w_hid, preferred_element_type=jnp.float32)
    acc = acc + b_fused

    new_h = acc[:, :hidden_dim]        # lane-aligned slice (H == 128)
    logits = acc[:, hidden_dim:]       # (B, Opad); pad lanes sit at ~NEG_FILL

    # Numerically stable log_softmax; padded lanes contribute exp() == 0.
    m = jnp.max(logits, axis=1, keepdims=True)
    shifted = logits - m
    lse = jnp.log(jnp.sum(jnp.exp(shifted), axis=1, keepdims=True))
    return shifted - lse, new_h


def rnn_step_kernel(word_ref, emb_ref, hidden_ref, w_emb_ref, w_hid_ref, b_ref,
                    logp_ref, newh_ref):
    logp, new_h = _rnn_cell(word_ref[...], emb_ref[...], hidden_ref[...],
                            w_emb_ref[...], w_hid_ref[...], b_ref[...],
                            newh_ref.shape[1])
    logp_ref[...] = logp
    newh_ref[...] = new_h


def rnn_seq_kernel(words_ref, hidden0_ref, emb_ref, w_emb_ref, w_hid_ref, b_ref,
                   logp_ref, newh_ref):
    t = pl.program_id(0)

    @pl.when(t == 0)
    def _():
        newh_ref[...] = hidden0_ref[...]          # seed the carried hidden state

    logp, new_h = _rnn_cell(words_ref[0], emb_ref[...], newh_ref[...],
                            w_emb_ref[...], w_hid_ref[...], b_ref[...],
                            newh_ref.shape[1])
    logp_ref[0] = logp
    newh_ref[...] = new_h                         # resident accumulator (carry)


def rnn_forward(word, hidden, params):
    """Single-step forward: matches RNN.forward(word, hidden)."""
    emb_pad, w_emb, w_hid, b_fused = (params["emb_pad"], params["w_emb"],
                                      params["w_hid"], params["b_fused"])
    B = word.shape[0]
    Vp, E = emb_pad.shape
    H = hidden.shape[1]
    Np = b_fused.shape[1]
    Opad = Np - H
    O = params["b_i2o"].shape[1]

    full = lambda shape: pl.BlockSpec(shape, lambda: tuple(0 for _ in shape))

    logp_pad, new_h = pl.pallas_call(
        rnn_step_kernel,
        out_shape=(jax.ShapeDtypeStruct((B, Opad), jnp.float32),
                   jax.ShapeDtypeStruct((B, H), jnp.float32)),
        in_specs=[full((B, 1)), full((Vp, E)), full((B, H)),
                  full((E, Np)), full((H, Np)), full((1, Np))],
        out_specs=(full((B, Opad)), full((B, H))),
    )(word.reshape(B, 1).astype(jnp.int32), emb_pad, hidden,
      w_emb, w_hid, b_fused)
    return logp_pad[:, :O], new_h


def rnn_forward_seq(words, hidden0, params):
    """T recurrent steps inside one pallas_call (grid over T).

    Weights / embedding table stay VMEM-resident (constant index_maps); the
    hidden state is carried in the resident new_h output block.
    """
    emb_pad, w_emb, w_hid, b_fused = (params["emb_pad"], params["w_emb"],
                                      params["w_hid"], params["b_fused"])
    T, B = words.shape
    Vp, E = emb_pad.shape
    H = hidden0.shape[1]
    Np = b_fused.shape[1]
    Opad = Np - H
    O = params["b_i2o"].shape[1]

    const = lambda shape: pl.BlockSpec(shape, lambda t: tuple(0 for _ in shape))

    logp_pad, new_h = pl.pallas_call(
        rnn_seq_kernel,
        out_shape=(jax.ShapeDtypeStruct((T, B, Opad), jnp.float32),
                   jax.ShapeDtypeStruct((B, H), jnp.float32)),
        grid=(T,),
        in_specs=[pl.BlockSpec((1, B, 1), lambda t: (t, 0, 0)),
                  const((B, H)), const((Vp, E)),
                  const((E, Np)), const((H, Np)), const((1, Np))],
        out_specs=(pl.BlockSpec((1, B, Opad), lambda t: (t, 0, 0)),
                   const((B, H))),
        compiler_params=pltpu.CompilerParams(
            dimension_semantics=("arbitrary",)),
    )(words.reshape(T, B, 1).astype(jnp.int32), hidden0, emb_pad,
      w_emb, w_hid, b_fused)
    return logp_pad[:, :, :O], new_h


def init_params(key, vocab_size, output_dim, embed_dim=256, hidden_dim=128):
    k1, k2, k3, k4, k5 = jax.random.split(key, 5)
    in_dim = embed_dim + hidden_dim
    emb = jax.random.normal(k1, (vocab_size, embed_dim), jnp.float32)
    lim = 1.0 / float(in_dim) ** 0.5
    w_i2h = jax.random.uniform(k2, (hidden_dim, in_dim), jnp.float32, -lim, lim)
    b_i2h = jax.random.uniform(k3, (hidden_dim,), jnp.float32, -lim, lim)
    w_i2o = jax.random.uniform(k4, (output_dim, in_dim), jnp.float32, -lim, lim)
    b_i2o = jax.random.uniform(k5, (output_dim,), jnp.float32, -lim, lim)

    LANE = 128
    o_pad = ((output_dim + LANE - 1) // LANE) * LANE     # 16  -> 128
    v_pad = ((vocab_size + LANE - 1) // LANE) * LANE     # 50  -> 128

    w_i2h_t = w_i2h.T                                    # (in_dim, H)
    w_i2o_t = w_i2o.T                                    # (in_dim, O)
    w_i2o_t_pad = jnp.pad(w_i2o_t, ((0, 0), (0, o_pad - output_dim)))
    w_fused = jnp.concatenate([w_i2h_t, w_i2o_t_pad], axis=1)   # (in_dim, H+o_pad)
    b_fused = jnp.concatenate(
        [b_i2h, b_i2o,
         jnp.full((o_pad - output_dim,), NEG_FILL, jnp.float32)]).reshape(1, -1)
    emb_pad = jnp.pad(emb, ((0, v_pad - vocab_size), (0, 0)))

    return {
        # raw parameters (reference path / shape metadata)
        "embeddings": emb,
        "w_i2h_t": w_i2h_t,
        "b_i2h": b_i2h.reshape(1, hidden_dim),
        "w_i2o_t": w_i2o_t,
        "b_i2o": b_i2o.reshape(1, output_dim),
        # fused / padded parameters consumed by the Pallas kernels
        "emb_pad": emb_pad,
        "w_emb": w_fused[:embed_dim],
        "w_hid": w_fused[embed_dim:],
        "b_fused": b_fused,
    }


def rnn_forward_ref(word, hidden, params):
    hp = jax.lax.Precision.HIGHEST
    embeds = jnp.take(params["embeddings"], word, axis=0)
    combined = jnp.concatenate([embeds, hidden], axis=1)
    combined = jnp.where(combined > 0, combined, LEAKY_SLOPE * combined)
    new_h = jnp.dot(combined, params["w_i2h_t"], precision=hp) + params["b_i2h"]
    out = jnp.dot(combined, params["w_i2o_t"], precision=hp) + params["b_i2o"]
    return jax.nn.log_softmax(out, axis=1), new_h


if __name__ == "__main__":
    key = jax.random.PRNGKey(0)
    kp, kw, kh, ks = jax.random.split(key, 4)

    vocab_size, output_dim = 50, 16
    embed_dim, hidden_dim = 256, 128
    batch, seq_len = 8, 6

    params = init_params(kp, vocab_size, output_dim, embed_dim, hidden_dim)
    word = jax.random.randint(kw, (batch,), 0, vocab_size, dtype=jnp.int32)
    hidden = jax.random.normal(kh, (batch, hidden_dim), jnp.float32)

    # --- single-step forward (exact module semantics) ---
    logp, new_h = jax.jit(rnn_forward)(word, hidden, params)
    jax.block_until_ready((logp, new_h))

    logp_ref, new_h_ref = rnn_forward_ref(word, hidden, params)
    assert logp.shape == (batch, output_dim)
    assert jnp.allclose(logp, logp_ref, atol=1e-4, rtol=1e-4)
    assert jnp.allclose(new_h, new_h_ref, atol=1e-4, rtol=1e-4)

    # --- fused in-kernel sequence recurrence (T steps, one pallas_call) ---
    words = jax.random.randint(ks, (seq_len, batch), 0, vocab_size,
                               dtype=jnp.int32)
    logp_seq, h_final = jax.jit(rnn_forward_seq)(words, hidden, params)
    jax.block_until_ready((logp_seq, h_final))

    h_r = hidden
    lp_list = []
    for t in range(seq_len):
        lp_t, h_r = rnn_forward_ref(words[t], h_r, params)
        lp_list.append(lp_t)
    logp_seq_ref = jnp.stack(lp_list, axis=0)
    assert jnp.allclose(logp_seq, logp_seq_ref, atol=1e-4, rtol=1e-4)
    assert jnp.allclose(h_final, h_r, atol=1e-4, rtol=1e-4)

    print("KERNEL_OK")
</pallas_src>

<mosaic_0001>
module attributes {stable_mosaic.version = 11 : i64} {
  func.func @rnn_step_kernel(%arg0: memref<8x1xi32, #tpu.memory_space<vmem>>, %arg1: memref<128x256xf32, #tpu.memory_space<vmem>>, %arg2: memref<8x128xf32, #tpu.memory_space<vmem>>, %arg3: memref<256x256xf32, #tpu.memory_space<vmem>>, %arg4: memref<128x256xf32, #tpu.memory_space<vmem>>, %arg5: memref<1x256xf32, #tpu.memory_space<vmem>>, %arg6: memref<8x128xf32, #tpu.memory_space<vmem>>, %arg7: memref<8x128xf32, #tpu.memory_space<vmem>>) attributes {dimension_semantics = [], scalar_prefetch = 0 : i64, scratch_operands = 0 : i64, tpu.core_type = #tpu.core_type<tc>} {
    %c0 = arith.constant 0 : index
    %c0_0 = arith.constant 0 : index
    %0 = vector.load %arg0[%c0, %c0_0] : memref<8x1xi32, #tpu.memory_space<vmem>>, vector<8x1xi32>
    %c0_1 = arith.constant 0 : index
    %c0_2 = arith.constant 0 : index
    %1 = vector.load %arg1[%c0_1, %c0_2] : memref<128x256xf32, #tpu.memory_space<vmem>>, vector<128x256xf32>
    %c0_3 = arith.constant 0 : index
    %c0_4 = arith.constant 0 : index
    %2 = vector.load %arg2[%c0_3, %c0_4] : memref<8x128xf32, #tpu.memory_space<vmem>>, vector<8x128xf32>
    %c0_5 = arith.constant 0 : index
    %c0_6 = arith.constant 0 : index
    %3 = vector.load %arg3[%c0_5, %c0_6] : memref<256x256xf32, #tpu.memory_space<vmem>>, vector<256x256xf32>
    %c0_7 = arith.constant 0 : index
    %c0_8 = arith.constant 0 : index
    %4 = vector.load %arg4[%c0_7, %c0_8] : memref<128x256xf32, #tpu.memory_space<vmem>>, vector<128x256xf32>
    %c0_9 = arith.constant 0 : index
    %c0_10 = arith.constant 0 : index
    %5 = vector.load %arg5[%c0_9, %c0_10] : memref<1x256xf32, #tpu.memory_space<vmem>>, vector<1x256xf32>
    %6 = tpu.iota {dimensions = array<i32: 1>} : vector<8x128xi32>
    %7 = vector.broadcast %0 : vector<8x1xi32> to vector<8x128xi32>
    %8 = arith.cmpi eq, %6, %7 : vector<8x128xi32>
    %9 = arith.extui %8 : vector<8x128xi1> to vector<8x128xi32>
    %10 = arith.sitofp %9 : vector<8x128xi32> to vector<8x128xf32>
    %cst = arith.constant dense<0.000000e+00> : vector<8x256xf32>
    %11 = tpu.matmul %10, %1, %cst {dimension_numbers = #tpu.dot_dimension_numbers<[1], [0], [0], [1], [0, 0, 1, 1], [], []>} : vector<8x128xf32>, vector<128x256xf32>, vector<8x256xf32> -> vector<8x256xf32>
    %cst_11 = arith.constant 0.000000e+00 : f32
    %12 = vector.broadcast %cst_11 : f32 to vector<8x256xf32>
    %13 = arith.cmpf ogt, %11, %12 : vector<8x256xf32>
    %cst_12 = arith.constant 0.00999999977 : f32
    %14 = vector.broadcast %cst_12 : f32 to vector<8x256xf32>
    %15 = arith.mulf %14, %11 : vector<8x256xf32>
    %16 = arith.select %13, %11, %15 : vector<8x256xi1>, vector<8x256xf32>
    %cst_13 = arith.constant 0.000000e+00 : f32
    %17 = vector.broadcast %cst_13 : f32 to vector<8x128xf32>
    %18 = arith.cmpf ogt, %2, %17 : vector<8x128xf32>
    %cst_14 = arith.constant 0.00999999977 : f32
    %19 = vector.broadcast %cst_14 : f32 to vector<8x128xf32>
    %20 = arith.mulf %19, %2 : vector<8x128xf32>
    %21 = arith.select %18, %2, %20 : vector<8x128xi1>, vector<8x128xf32>
    %cst_15 = arith.constant dense<0.000000e+00> : vector<8x256xf32>
    %22 = tpu.matmul %16, %3, %cst_15 {dimension_numbers = #tpu.dot_dimension_numbers<[1], [0], [0], [1], [0, 0, 1, 1], [], []>} : vector<8x256xf32>, vector<256x256xf32>, vector<8x256xf32> -> vector<8x256xf32>
    %cst_16 = arith.constant dense<0.000000e+00> : vector<8x256xf32>
    %23 = tpu.matmul %21, %4, %cst_16 {dimension_numbers = #tpu.dot_dimension_numbers<[1], [0], [0], [1], [0, 0, 1, 1], [], []>} : vector<8x128xf32>, vector<128x256xf32>, vector<8x256xf32> -> vector<8x256xf32>
    %24 = arith.addf %22, %23 : vector<8x256xf32>
    %25 = vector.broadcast %5 : vector<1x256xf32> to vector<8x256xf32>
    %26 = arith.addf %24, %25 : vector<8x256xf32>
    %27 = vector.extract_strided_slice %26 {offsets = [0, 0], sizes = [8, 128], strides = [1, 1]} : vector<8x256xf32> to vector<8x128xf32>
    %28 = vector.extract_strided_slice %26 {offsets = [0, 128], sizes = [8, 128], strides = [1, 1]} : vector<8x256xf32> to vector<8x128xf32>
    %cst_17 = arith.constant dense<0xFF800000> : vector<8xf32>
    %29 = vector.multi_reduction <maximumf>, %28, %cst_17 [1] : vector<8x128xf32> to vector<8xf32>
    %30 = vector.shape_cast %29 : vector<8xf32> to vector<8x1xf32>
    %31 = vector.broadcast %30 : vector<8x1xf32> to vector<8x128xf32>
    %32 = arith.subf %28, %31 : vector<8x128xf32>
    %33 = math.exp %32 : vector<8x128xf32>
    %cst_18 = arith.constant dense<0.000000e+00> : vector<8xf32>
    %34 = vector.multi_reduction <add>, %33, %cst_18 [1] : vector<8x128xf32> to vector<8xf32>
    %35 = vector.shape_cast %34 : vector<8xf32> to vector<8x1xf32>
    %36 = math.log %35 : vector<8x1xf32>
    %37 = vector.broadcast %36 : vector<8x1xf32> to vector<8x128xf32>
    %38 = arith.subf %32, %37 : vector<8x128xf32>
    %c0_19 = arith.constant 0 : index
    %c0_20 = arith.constant 0 : index
    %39 = vector.load %arg6[%c0_19, %c0_20] : memref<8x128xf32, #tpu.memory_space<vmem>>, vector<8x128xf32>
    tpu.vector_store %arg6[%c0_19, %c0_20], %38 {strides = array<i32>} : memref<8x128xf32, #tpu.memory_space<vmem>>, vector<8x128xf32>,
    %c0_21 = arith.constant 0 : index
    %c0_22 = arith.constant 0 : index
    %40 = vector.load %arg7[%c0_21, %c0_22] : memref<8x128xf32, #tpu.memory_space<vmem>>, vector<8x128xf32>
    tpu.vector_store %arg7[%c0_21, %c0_22], %27 {strides = array<i32>} : memref<8x128xf32, #tpu.memory_space<vmem>>, vector<8x128xf32>,
    return
  }
}

</mosaic_0001>

<bundles_post_ra>
// kernel: rnn_forward.1
= control target key start
LH: loop header
LB: loop body
LE: loop exit
PB: predicated region body
PF: predicated region fallthrough
CT: control target
= control target key end

     0   :  { %13 = vsyncpa [#allocation3], 0  ;;  %s888_s0 = inlined_call_operand.vmem [shape: s32[8,1], index: 0, kind: input, shape index: {}]   ;;  %s889_s1 = inlined_call_operand.hbm [shape: f32[128,256], index: 1, kind: input, shape index: {}]   ;;  %s890_s2 = inlined_call_operand.vmem [shape: f32[8,128], index: 2, kind: input, shape index: {}]   ;;  %s891_s3 = inlined_call_operand.hbm [shape: f32[256,256], index: 3, kind: input, shape index: {}]   ;;  %s892_s4 = inlined_call_operand.hbm [shape: f32[128,256], index: 4, kind: input, shape index: {}]   ;;  %s893_s5 = inlined_call_operand.vmem [shape: f32[1,256], index: 5, kind: input, shape index: {}]   ;;  %s894_s6 = inlined_call_operand.hbm [shape: f32[8,128], index: 6, kind: output, shape index: {0}]   ;;  %s895_s7 = inlined_call_operand.hbm [shape: f32[8,128], index: 7, kind: output, shape index: {1}]  }
   0x1   :  { %14 = vsyncpa [#allocation6], 0 }
   0x2   :  { %15 = vsyncpa [#allocation4], 0 }
   0x3   :  { %16 = vsyncpa [#allocation10], 0  ;;  %s749_s24 = smov [#allocation5]   ;;  %s750_s26 = smov [#allocation2]  }
   0x4   :  { %s38_s25 = sshll.u32 %s749_s24, 4  ;;  %s24_s27 = sshll.u32 %s750_s26, 4  ;;  %s39_s25 = int_to_ptr.vmem [resolvable:$true] %s38_s25  ;;  %s799_s27 = int_to_ptr.vmem [resolvable:$true] %s24_s27 }
   0x5   :  { %s631_s30 = scalar_lea.hbm %s891_s3, 8192 }
   0x6   :  { %p632_p0 = scmp.ne.s32.totalorder %s891_s3, %s631_s30  ;;  %p635_p1 = scmp.lt.u32.totalorder %s631_s30, %s891_s3 }
   0x8   :  { %p637_p2 = pnand %p635_p1, %p632_p0 }
   0xa   :  { %640 = shalt.err (!%p637_p2)
}
   0xb   :  { %s641_s12 = scalar_lea.vmem %s39_s25, 8192  ;;  %p646_p4 = scmp.lt.s32.totalorder %s39_s25, %s39_s25 }
   0xc   :  { %p642_p3 = scmp.ne.s32.totalorder %s39_s25, %s641_s12  ;;  %p647_p5 = scmp.lt.s32.totalorder %s641_s12, %s641_s12 }
   0xe   :  { %p648_p6 = por %p647_p5, %p646_p4 }
  0x10   :  { %p649_p7 = pnand %p648_p6, %p642_p3 }
  0x12   :  { %652 = shalt.err (!%p649_p7)
}
  0x13   :  { %s751_s13 = smov 256   ;;  %s752_s14 = smov 16  }
  0x14   :  { %44 = dma.hbm_to_vmem [thread:$0]  %s891_s3, 8192, %s39_s25, [#allocation6], %s751_s13, %s751_s13, %s752_s14  }
  0x15   :  { %s653_s19 = scalar_lea.hbm %s889_s1, 4096 }
  0x16   :  { %p654_p8 = scmp.ne.s32.totalorder %s889_s1, %s653_s19  ;;  %p657_p9 = scmp.lt.u32.totalorder %s653_s19, %s889_s1 }
  0x18   :  { %p659_p10 = pnand %p657_p9, %p654_p8 }
  0x1a   :  { %662 = shalt.err (!%p659_p10)
}
  0x1b   :  { %s663_s24 = scalar_lea.vmem %s799_s27, 4096  ;;  %p668_p12 = scmp.lt.s32.totalorder %s799_s27, %s799_s27 }
  0x1c   :  { %p664_p11 = scmp.ne.s32.totalorder %s799_s27, %s663_s24  ;;  %p669_p13 = scmp.lt.s32.totalorder %s663_s24, %s663_s24 }
  0x1e   :  { %p670_p0 = por %p669_p13, %p668_p12 }
  0x20   :  { %p671_p1 = pnand %p670_p0, %p664_p11 }
  0x22   :  { %674 = shalt.err (!%p671_p1)
}
  0x23   :  { %30 = dma.hbm_to_vmem [thread:$0]  %s889_s1, 4096, %s799_s27, [#allocation3], %s751_s13, %s751_s13, %s752_s14  }
  0x24   :  { %s753_s26 = smov [#allocation7]   ;;  %s675_s8 = scalar_lea.hbm %s892_s4, 4096 }
  0x25   :  { %s50_s28 = sshll.u32 %s753_s26, 4  ;;  %p676_p2 = scmp.ne.s32.totalorder %s892_s4, %s675_s8  ;;  %s51_s28 = int_to_ptr.vmem [resolvable:$true] %s50_s28 }
  0x26   :  { %p679_p3 = scmp.lt.u32.totalorder %s675_s8, %s892_s4 }
  0x28   :  { %p681_p4 = pnand %p679_p3, %p676_p2 }
  0x2a   :  { %684 = shalt.err (!%p681_p4)
}
  0x2b   :  { %s685_s15 = scalar_lea.vmem %s51_s28, 4096  ;;  %p690_p6 = scmp.lt.s32.totalorder %s51_s28, %s51_s28 }
  0x2c   :  { %p686_p5 = scmp.ne.s32.totalorder %s51_s28, %s685_s15  ;;  %p691_p7 = scmp.lt.s32.totalorder %s685_s15, %s685_s15 }
  0x2e   :  { %p692_p8 = por %p691_p7, %p690_p6 }
  0x30   :  { %p693_p9 = pnand %p692_p8, %p686_p5 }
  0x32   :  { %696 = shalt.err (!%p693_p9)
}
  0x33   :  { %56 = dma.hbm_to_vmem [thread:$0]  %s892_s4, 4096, %s51_s28, [#allocation6], %s751_s13, %s751_s13, %s752_s14  }
  0x34   :  { %741 = dma.done.wait [#allocation3], 4096  }
  0x35   :  { %742 = vsyncadd [#allocation3], 4294963200 }
  0x36   :  { %743 = dma.done.wait [#allocation6], 12288  }
  0x37   :  { %744 = vsyncadd [#allocation6], 4294955008  ;;  %v754_v0 = vmov 0   ;;  %v68_v1 = vld [vmem:[%s888_s0] sm:$0xff]  ;;  %v70_v2 = vld [vmem:[#allocation2 + $0x8] sm:$0xff]  ;;  %v755_v8 = vmov 0.0  }
  0x38   :  { %626 = vset.pattern.permute.xlu0 %v754_v0  ;;  %v72_v3 = vld [vmem:[#allocation2 + $0x18] sm:$0xff]  ;;  %v69_v5 = vld [vmem:[#allocation2] sm:$0xff]  ;;  %v71_v6 = vld [vmem:[#allocation2 + $0x10] sm:$0xff]  ;;  %271 = vmatprep.mubr.f32.mxu0 %v755_v8  ;;  %s757_s14 = smov [#allocation9]  }
  0x39   :  { %202 = vperm.xlu0 %626, %v68_v1   ;;  %v486_v4 = vpack.c.bf16 %v72_v3, %v70_v2  ;;  %v74_v7 = vld [vmem:[#allocation2 + $0x28] sm:$0xff]  ;;  %v488_v9 = vpack.c.bf16 %v71_v6, %v69_v5  ;;  %v76_v10 = vld [vmem:[#allocation2 + $0x38] sm:$0xff]  ;;  %v73_v11 = vld [vmem:[#allocation2 + $0x20] sm:$0xff]  ;;  %s470_s18 = sshll.u32 %s757_s14, 4  ;;  %s471_s18 = int_to_ptr.vmem [resolvable:$true] %s470_s18 }
  0x3a   :  { %v75_v12 = vld [vmem:[#allocation2 + $0x30] sm:$0xff]  ;;  %v490_v13 = vpack.c.bf16 %v76_v10, %v74_v7  ;;  %v78_v14 = vld [vmem:[#allocation2 + $0x48] sm:$0xff]  ;;  %v80_v15 = vld [vmem:[#allocation2 + $0x58] sm:$0xff]  ;;  %p702_p11 = scmp.lt.s32.totalorder %s471_s18, %s471_s18 }
  0x3b   :  { %487 = vmatprep.subr.bf16.mxu0 %v486_v4  ;;  %v492_v16 = vpack.c.bf16 %v75_v12, %v73_v11  ;;  %v494_v17 = vpack.c.bf16 %v80_v15, %v78_v14  ;;  %v77_v18 = vld [vmem:[#allocation2 + $0x40] sm:$0xff]  ;;  %v79_v19 = vld [vmem:[#allocation2 + $0x50] sm:$0xff]  ;;  %v82_v20 = vld [vmem:[#allocation2 + $0x68] sm:$0xff] }
  0x3c   :  { %489 = vmatpush1.bf16.msra.mxu0 %v488_v9  ;;  %v84_v21 = vld [vmem:[#allocation2 + $0x78] sm:$0xff]  ;;  %v496_v22 = vpack.c.bf16 %v79_v19, %v77_v18  ;;  %v81_v24 = vld [vmem:[#allocation2 + $0x60] sm:$0xff]  ;;  %v83_v25 = vld [vmem:[#allocation2 + $0x70] sm:$0xff] }
  0x3d   :  { %491 = vmatprep.subr.bf16.mxu0 %v490_v13  ;;  %v498_v23 = vpack.c.bf16 %v84_v21, %v82_v20  ;;  %v86_v26 = vld [vmem:[#allocation2 + $0x88] sm:$0xff]  ;;  %v88_v27 = vld [vmem:[#allocation2 + $0x98] sm:$0xff]  ;;  %v85_v28 = vld [vmem:[#allocation2 + $0x80] sm:$0xff]  ;;  %v500_v33 = vpack.c.bf16 %v83_v25, %v81_v24 }
  0x3e   :  { %v87_v29 = vld [vmem:[#allocation2 + $0x90] sm:$0xff]  ;;  %v103_v30 = vld [vmem:[#allocation5 + $0x8] sm:$0xff]  ;;  %v105_v31 = vld [vmem:[#allocation5 + $0x18] sm:$0xff]  ;;  %v502_v38 = vpack.c.bf16 %v88_v27, %v86_v26 }
  0x3f   :  { %v102_v32 = vld [vmem:[#allocation5] sm:$0xff]  ;;  %v550_v34 = vpack.c.bf16 %v105_v31, %v103_v30  ;;  %v104_v35 = vld [vmem:[#allocation5 + $0x10] sm:$0xff]  ;;  %v107_v36 = vld [vmem:[#allocation5 + $0x28] sm:$0xff]  ;;  %v504_v48 = vpack.c.bf16 %v87_v29, %v85_v28 }
  0x40   :  { %493 = vmatpush1.bf16.msra.mxu0 %v492_v16  ;;  %v109_v37 = vld [vmem:[#allocation5 + $0x38] sm:$0xff]  ;;  %v552_v39 = vpack.c.bf16 %v104_v35, %v102_v32  ;;  %v106_v41 = vld [vmem:[#allocation5 + $0x20] sm:$0xff]  ;;  %v108_v42 = vld [vmem:[#allocation5 + $0x30] sm:$0xff] }
  0x41   :  { %495 = vmatprep.subr.bf16.mxu0 %v494_v17  ;;  %v554_v40 = vpack.c.bf16 %v109_v37, %v107_v36  ;;  %v111_v43 = vld [vmem:[#allocation5 + $0x48] sm:$0xff]  ;;  %v92_v45 = vld [vmem:[#allocation2 + $0xb8] sm:$0xff]  ;;  %551 = vmatprep.subr.bf16.mxu1 %v550_v34  ;;  %v556_v47 = vpack.c.bf16 %v108_v42, %v106_v41  ;;  %v89_v49 = vld [vmem:[#allocation2 + $0xa0] sm:$0xff] }
  0x42   :  { %v90_v44 = vld [vmem:[#allocation2 + $0xa8] sm:$0xff]  ;;  %v113_v46 = vld [vmem:[#allocation5 + $0x58] sm:$0xff]  ;;  %553 = vmatpush1.bf16.msra.mxu1 %v552_v39  ;;  %v110_v51 = vld [vmem:[#allocation5 + $0x40] sm:$0xff] }
  0x43   :  { %555 = vmatprep.subr.bf16.mxu1 %v554_v40  ;;  %v558_v50 = vpack.c.bf16 %v113_v46, %v111_v43  ;;  %v112_v52 = vld [vmem:[#allocation5 + $0x50] sm:$0xff]  ;;  %v506_v53 = vpack.c.bf16 %v92_v45, %v90_v44  ;;  %v115_v55 = vld [vmem:[#allocation5 + $0x68] sm:$0xff]  ;;  %v117_v56 = vld [vmem:[#allocation5 + $0x78] sm:$0xff] }
  0x44   :  { %497 = vmatpush1.bf16.msra.mxu0 %v496_v22  ;;  %v91_v54 = vld [vmem:[#allocation2 + $0xb0] sm:$0xff]  ;;  %v94_v57 = vld [vmem:[#allocation2 + $0xc8] sm:$0xff]  ;;  %v96_v58 = vld [vmem:[#allocation2 + $0xd8] sm:$0xff]  ;;  %v560_v59 = vpack.c.bf16 %v112_v52, %v110_v51  ;;  %v562_v62 = vpack.c.bf16 %v117_v56, %v115_v55 }
  0x45   :  { %499 = vmatprep.subr.bf16.mxu0 %v498_v23  ;;  %v508_v60 = vpack.c.bf16 %v91_v54, %v89_v49  ;;  %v93_v61 = vld [vmem:[#allocation2 + $0xc0] sm:$0xff]  ;;  %v116_v0 = vld [vmem:[#allocation5 + $0x70] sm:$0xff]  ;;  %v510_v1 = vpack.c.bf16 %v96_v58, %v94_v57  ;;  %v119_v3 = vld [vmem:[#allocation5 + $0x88] sm:$0xff] }
  0x46   :  { %557 = vmatpush1.bf16.msra.mxu1 %v556_v47  ;;  %v114_v63 = vld [vmem:[#allocation5 + $0x60] sm:$0xff]  ;;  %v95_v2 = vld [vmem:[#allocation2 + $0xd0] sm:$0xff]  ;;  %v121_v4 = vld [vmem:[#allocation5 + $0x98] sm:$0xff] }
  0x47   :  { %559 = vmatprep.subr.bf16.mxu1 %v558_v50  ;;  %v98_v5 = vld [vmem:[#allocation2 + $0xe8] sm:$0xff]  ;;  %v100_v6 = vld [vmem:[#allocation2 + $0xf8] sm:$0xff]  ;;  %v564_v7 = vpack.c.bf16 %v116_v0, %v114_v63  ;;  %v512_v9 = vpack.c.bf16 %v95_v2, %v93_v61  ;;  %v97_v10 = vld [vmem:[#allocation2 + $0xe0] sm:$0xff]  ;;  %v566_v11 = vpack.c.bf16 %v121_v4, %v119_v3 }
  0x48   :  { %501 = vmatpush1.bf16.msra.mxu0 %v500_v33  ;;  %v118_v12 = vld [vmem:[#allocation5 + $0x80] sm:$0xff]  ;;  %v120_v13 = vld [vmem:[#allocation5 + $0x90] sm:$0xff]  ;;  %v514_v14 = vpack.c.bf16 %v100_v6, %v98_v5  ;;  %v123_v16 = vld [vmem:[#allocation5 + $0xa8] sm:$0xff] }
  0x49   :  { %503 = vmatprep.subr.bf16.mxu0 %v502_v38  ;;  %v99_v15 = vld [vmem:[#allocation2 + $0xf0] sm:$0xff]  ;;  %v125_v17 = vld [vmem:[#allocation5 + $0xb8] sm:$0xff]  ;;  %v167_v18 = vld [vmem:[#allocation7 + $0x8] sm:$0xff]  ;;  %v568_v20 = vpack.c.bf16 %v120_v13, %v118_v12 }
  0x4a   :  { %561 = vmatpush1.bf16.msra.mxu1 %v560_v59  ;;  %v169_v19 = vld [vmem:[#allocation7 + $0x18] sm:$0xff]  ;;  %v516_v21 = vpack.c.bf16 %v99_v15, %v97_v10  ;;  %v570_v22 = vpack.c.bf16 %v125_v17, %v123_v16  ;;  %v122_v23 = vld [vmem:[#allocation5 + $0xa0] sm:$0xff]  ;;  %v124_v24 = vld [vmem:[#allocation5 + $0xb0] sm:$0xff] }
  0x4b   :  { %563 = vmatprep.subr.bf16.mxu1 %v562_v62  ;;  %v127_v25 = vld [vmem:[#allocation5 + $0xc8] sm:$0xff]  ;;  %v129_v26 = vld [vmem:[#allocation5 + $0xd8] sm:$0xff]  ;;  %v518_v27 = vpack.c.bf16 %v169_v19, %v167_v18  ;;  %v572_v28 = vpack.c.bf16 %v124_v24, %v122_v23  ;;  %v126_v30 = vld [vmem:[#allocation5 + $0xc0] sm:$0xff]  ;;  %v199_v18 = vlaneseq }
  0x4c   :  { %505 = vmatpush1.bf16.msra.mxu0 %v504_v48  ;;  %v574_v29 = vpack.c.bf16 %v129_v26, %v127_v25  ;;  %v128_v31 = vld [vmem:[#allocation5 + $0xd0] sm:$0xff]  ;;  %v131_v32 = vld [vmem:[#allocation5 + $0xe8] sm:$0xff]  ;;  %v133_v33 = vld [vmem:[#allocation5 + $0xf8] sm:$0xff] }
  0x4d   :  { %507 = vmatprep.subr.bf16.mxu0 %v506_v53  ;;  %v576_v34 = vpack.c.bf16 %v128_v31, %v126_v30  ;;  %v578_v35 = vpack.c.bf16 %v133_v33, %v131_v32  ;;  %v130_v36 = vld [vmem:[#allocation5 + $0xe0] sm:$0xff]  ;;  %v132_v37 = vld [vmem:[#allocation5 + $0xf0] sm:$0xff]  ;;  %v135_v38 = vld [vmem:[#allocation5 + $0x108] sm:$0xff]  ;;  %v756_v31 = vmov 1.0  }
  0x4e   :  { %565 = vmatpush1.bf16.msra.mxu1 %v564_v7  ;;  %v137_v39 = vld [vmem:[#allocation5 + $0x118] sm:$0xff]  ;;  %v580_v40 = vpack.c.bf16 %v132_v37, %v130_v36  ;;  %v134_v42 = vld [vmem:[#allocation5 + $0x100] sm:$0xff]  ;;  %v136_v43 = vld [vmem:[#allocation5 + $0x110] sm:$0xff] }
  0x4f   :  { %567 = vmatprep.subr.bf16.mxu1 %v566_v11  ;;  %v582_v41 = vpack.c.bf16 %v137_v39, %v135_v38  ;;  %v139_v44 = vld [vmem:[#allocation5 + $0x128] sm:$0xff]  ;;  %v141_v45 = vld [vmem:[#allocation5 + $0x138] sm:$0xff]  ;;  %v584_v46 = vpack.c.bf16 %v136_v43, %v134_v42  ;;  %v138_v48 = vld [vmem:[#allocation5 + $0x120] sm:$0xff] }
  0x50   :  { %509 = vmatpush1.bf16.msra.mxu0 %v508_v60  ;;  %v586_v47 = vpack.c.bf16 %v141_v45, %v139_v44  ;;  %v140_v49 = vld [vmem:[#allocation5 + $0x130] sm:$0xff]  ;;  %v143_v50 = vld [vmem:[#allocation5 + $0x148] sm:$0xff]  ;;  %v145_v51 = vld [vmem:[#allocation5 + $0x158] sm:$0xff] }
  0x51   :  { %511 = vmatprep.subr.bf16.mxu0 %v510_v1  ;;  %v588_v52 = vpack.c.bf16 %v140_v49, %v138_v48  ;;  %v590_v53 = vpack.c.bf16 %v145_v51, %v143_v50  ;;  %v142_v54 = vld [vmem:[#allocation5 + $0x140] sm:$0xff]  ;;  %v144_v55 = vld [vmem:[#allocation5 + $0x150] sm:$0xff]  ;;  %v147_v56 = vld [vmem:[#allocation5 + $0x168] sm:$0xff] }
  0x52   :  { %569 = vmatpush1.bf16.msra.mxu1 %v568_v20  ;;  %v149_v57 = vld [vmem:[#allocation5 + $0x178] sm:$0xff]  ;;  %v592_v58 = vpack.c.bf16 %v144_v55, %v142_v54  ;;  %v146_v60 = vld [vmem:[#allocation5 + $0x160] sm:$0xff]  ;;  %v148_v61 = vld [vmem:[#allocation5 + $0x170] sm:$0xff] }
  0x53   :  { %571 = vmatprep.subr.bf16.mxu1 %v570_v22  ;;  %v594_v59 = vpack.c.bf16 %v149_v57, %v147_v56  ;;  %v151_v62 = vld [vmem:[#allocation5 + $0x188] sm:$0xff]  ;;  %v153_v63 = vld [vmem:[#allocation5 + $0x198] sm:$0xff]  ;;  %v596_v0 = vpack.c.bf16 %v148_v61, %v146_v60  ;;  %v150_v2 = vld [vmem:[#allocation5 + $0x180] sm:$0xff] }
  0x54   :  { %513 = vmatpush1.bf16.msra.mxu0 %v512_v9  ;;  %v598_v1 = vpack.c.bf16 %v153_v63, %v151_v62  ;;  %v152_v3 = vld [vmem:[#allocation5 + $0x190] sm:$0xff]  ;;  %v155_v4 = vld [vmem:[#allocation5 + $0x1a8] sm:$0xff]  ;;  %v157_v5 = vld [vmem:[#allocation5 + $0x1b8] sm:$0xff] }
  0x55   :  { %515 = vmatprep.subr.bf16.mxu0 %v514_v14  ;;  %v600_v6 = vpack.c.bf16 %v152_v3, %v150_v2  ;;  %v602_v7 = vpack.c.bf16 %v157_v5, %v155_v4  ;;  %v154_v9 = vld [vmem:[#allocation5 + $0x1a0] sm:$0xff]  ;;  %v156_v10 = vld [vmem:[#allocation5 + $0x1b0] sm:$0xff]  ;;  %v159_v11 = vld [vmem:[#allocation5 + $0x1c8] sm:$0xff] }
  0x56   :  { %573 = vmatpush1.bf16.msra.mxu1 %v572_v28  ;;  %v161_v12 = vld [vmem:[#allocation5 + $0x1d8] sm:$0xff]  ;;  %v604_v13 = vpack.c.bf16 %v156_v10, %v154_v9  ;;  %v158_v15 = vld [vmem:[#allocation5 + $0x1c0] sm:$0xff]  ;;  %v160_v16 = vld [vmem:[#allocation5 + $0x1d0] sm:$0xff] }
  0x57   :  { %575 = vmatprep.subr.bf16.mxu1 %v574_v29  ;;  %v606_v14 = vpack.c.bf16 %v161_v12, %v159_v11  ;;  %v608_v17 = vpack.c.bf16 %v160_v16, %v158_v15  ;;  %v166_v19 = vld [vmem:[#allocation7] sm:$0xff]  ;;  %v168_v20 = vld [vmem:[#allocation7 + $0x10] sm:$0xff]  ;;  %v171_v22 = vld [vmem:[#allocation7 + $0x28] sm:$0xff] }
  0x58   :  { %517 = vmatpush1.bf16.msra.mxu0 %v516_v21  ;;  %v200_v21 = vand.u32 127, %v199_v18  ;;  %v173_v23 = vld [vmem:[#allocation7 + $0x38] sm:$0xff]  ;;  %v520_v24 = vpack.c.bf16 %v168_v20, %v166_v19  ;;  %v172_v28 = vld [vmem:[#allocation7 + $0x30] sm:$0xff]  ;;  %v175_v29 = vld [vmem:[#allocation7 + $0x48] sm:$0xff] }
  0x59   :  { %519 = vmatprep.subr.bf16.mxu0 %v518_v27  ;;  %v522_v26 = vpack.c.bf16 %v173_v23, %v171_v22  ;;  %v170_v27 = vld [vmem:[#allocation7 + $0x20] sm:$0xff]  ;;  %v177_v30 = vld [vmem:[#allocation7 + $0x58] sm:$0xff]  ;;  %v179_v36 = vld [vmem:[#allocation7 + $0x68] sm:$0xff] }
  0x5a   :  { %577 = vmatpush1.bf16.msra.mxu1 %v576_v34  ;;  %v524_v32 = vpack.c.bf16 %v172_v28, %v170_v27  ;;  %v526_v33 = vpack.c.bf16 %v177_v30, %v175_v29  ;;  %v174_v34 = vld [vmem:[#allocation7 + $0x40] sm:$0xff]  ;;  %v181_v37 = vld [vmem:[#allocation7 + $0x78] sm:$0xff]  ;;  %v183_v42 = vld [vmem:[#allocation7 + $0x88] sm:$0xff] }
  0x5b   :  { %579 = vmatprep.subr.bf16.mxu1 %v578_v35  ;;  %v176_v35 = vld [vmem:[#allocation7 + $0x50] sm:$0xff]  ;;  %v530_v39 = vpack.c.bf16 %v181_v37, %v179_v36  ;;  %v185_v43 = vld [vmem:[#allocation7 + $0x98] sm:$0xff]  ;;  %v186_v51 = vld [vmem:[#allocation7 + $0xa0] sm:$0xff] }
  0x5c   :  { %v528_v38 = vpack.c.bf16 %v176_v35, %v174_v34  ;;  %v534_v45 = vpack.c.bf16 %v185_v43, %v183_v42  ;;  %v189_v48 = vld [vmem:[#allocation7 + $0xb8] sm:$0xff]  ;;  %v190_v57 = vld [vmem:[#allocation7 + $0xc0] sm:$0xff]  ;;  %v195_v60 = vld [vmem:[#allocation7 + $0xe8] sm:$0xff] }
  0x5d   :  { %v193_v54 = vld [vmem:[#allocation7 + $0xd8] sm:$0xff]  ;;  %v194_v63 = vld [vmem:[#allocation7 + $0xe0] sm:$0xff]  ;;  %v164_v5 = vld [vmem:[#allocation5 + $0x1f0] sm:$0xff] }
  0x5e   :  { %581 = vmatpush1.bf16.msra.mxu1 %v580_v40  ;;  %v178_v40 = vld [vmem:[#allocation7 + $0x60] sm:$0xff]  ;;  %v197_v61 = vld [vmem:[#allocation7 + $0xf8] sm:$0xff] }
  0x5f   :  { %583 = vmatprep.subr.bf16.mxu1 %v582_v41  ;;  %v180_v41 = vld [vmem:[#allocation7 + $0x70] sm:$0xff]  ;;  %v546_v62 = vpack.c.bf16 %v197_v61, %v195_v60  ;;  %v165_v3 = vld [vmem:[#allocation5 + $0x1f8] sm:$0xff]  ;;  %v162_v4 = vld [vmem:[#allocation5 + $0x1e0] sm:$0xff] }
  0x60   :  { %v532_v44 = vpack.c.bf16 %v180_v41, %v178_v40  ;;  %v101_v9 = vld [vmem:[%s890_s2] sm:$0xff] }
  0x61   :  { %vm284_vm1 = vcmp.gt.f32.partialorder %v101_v9, 0.0  ;;  %v285_v10 = vmul.f32 0.01, %v101_v9  ;;  %v198_v23 = vld [vmem:[%s893_s5] sm:$0x3]  ;;  %s697_s5 = scalar_lea.vmem %s471_s18, 128 }
  0x62   :  { %585 = vmatpush1.bf16.msra.mxu1 %v584_v46  ;;  %v182_v46 = vld [vmem:[#allocation7 + $0x80] sm:$0xff]  ;;  %p698_p10 = scmp.ne.s32.totalorder %s471_s18, %s697_s5  ;;  %p703_p12 = scmp.lt.s32.totalorder %s697_s5, %s697_s5 }
  0x63   :  { %587 = vmatprep.subr.bf16.mxu1 %v586_v47  ;;  %v187_v47 = vld [vmem:[#allocation7 + $0xa8] sm:$0xff]  ;;  %v286_v11 = vsel %vm284_vm1, %v101_v9, %v285_v10 }
  0x64   :  { %v538_v50 = vpack.c.bf16 %v189_v48, %v187_v47  ;;  %p704_p13 = por %p703_p12, %p702_p11 }
  0x66   :  { %589 = vmatpush1.bf16.msra.mxu1 %v588_v52  ;;  %v188_v52 = vld [vmem:[#allocation7 + $0xb0] sm:$0xff]  ;;  %p705_p0 = pnand %p704_p13, %p698_p10 }
  0x67   :  { %591 = vmatprep.subr.bf16.mxu1 %v590_v53  ;;  %v191_v53 = vld [vmem:[#allocation7 + $0xc8] sm:$0xff]  ;;  %v540_v55 = vpack.c.bf16 %v188_v52, %v186_v51 }
  0x68   :  { %v542_v56 = vpack.c.bf16 %v193_v54, %v191_v53 }
  0x6a   :  { %593 = vmatpush1.bf16.msra.mxu1 %v592_v58  ;;  %v192_v58 = vld [vmem:[#allocation7 + $0xd0] sm:$0xff] }
  0x6b   :  { %595 = vmatprep.subr.bf16.mxu1 %v594_v59  ;;  %v544_v59 = vpack.c.bf16 %v192_v58, %v190_v57 }
  0x6e   :  { %597 = vmatpush1.bf16.msra.mxu1 %v596_v0  ;;  %v196_v0 = vld [vmem:[#allocation7 + $0xf0] sm:$0xff] }
  0x6f   :  { %599 = vmatprep.subr.bf16.mxu1 %v598_v1  ;;  %v163_v1 = vld [vmem:[#allocation5 + $0x1e8] sm:$0xff]  ;;  %v548_v2 = vpack.c.bf16 %v196_v0, %v194_v63 }
  0x72   :  { %601 = vmatpush1.bf16.msra.mxu1 %v600_v6  ;;  %v610_v6 = vpack.c.bf16 %v165_v3, %v163_v1 }
  0x73   :  { %603 = vmatprep.subr.bf16.mxu1 %v602_v7  ;;  %v612_v7 = vpack.c.bf16 %v164_v5, %v162_v4 }
  0x76   :  { %605 = vmatpush1.bf16.msra.mxu1 %v604_v13 }
  0x77   :  { %607 = vmatprep.subr.bf16.mxu1 %v606_v14 }
  0x7a   :  { %609 = vmatpush1.bf16.msra.mxu1 %v608_v17 }
  0x7b   :  { %611 = vmatprep.subr.bf16.mxu1 %v610_v6 }
  0x7e   :  { %613 = vmatpush1.bf16.msra.mxu1 %v612_v7 }
  0xb8   :  { %v203_v25 = vpop.permute.xlu0 %202 }
  0xb9   :  { %vm204_vm0 = vcmp.eq.s32.totalorder %v200_v21, %v203_v25  ;;  %v431_v21 = vshrl.u32 %v199_v18, 7 }
  0xba   :  { %485 = vmatmul.mubr.msk.f32.vlgmr.msra.gmra.mrb[0].mxu0 %vm204_vm0, %v756_v31 }
  0xbb   :  { %521 = vmatpush1.bf16.msra.mxu0 %v520_v24  ;;  %351 = vmatprep.mubr.f32.mxu0 %v755_v8  ;;  %v184_v8 = vld [vmem:[#allocation7 + $0x90] sm:$0xff]  ;;  %v432_v22 = vsub.s32 0, %v431_v21  ;;  %v436_v24 = vsub.s32 1, %v431_v21 }
  0xbc   :  { %523 = vmatprep.subr.bf16.mxu0 %v522_v26  ;;  %v536_v49 = vpack.c.bf16 %v184_v8, %v182_v46 }
  0xbd   :  { %v433_v25 = vrot.slane %v198_v23, %v432_v22  ;;  %v437_v27 = vrot.slane %v198_v23, %v436_v24 }
  0xbf   :  { %525 = vmatpush1.bf16.msra.mxu0 %v524_v32 }
  0xc0   :  { %527 = vmatprep.subr.bf16.mxu0 %v526_v33 }
  0xc3   :  { %529 = vmatpush1.bf16.msra.mxu0 %v528_v38 }
  0xc4   :  { %531 = vmatprep.subr.bf16.mxu0 %v530_v39 }
  0xc7   :  { %533 = vmatpush1.bf16.msra.mxu0 %v532_v44 }
  0xc8   :  { %535 = vmatprep.subr.bf16.mxu0 %v534_v45 }
  0xcb   :  { %537 = vmatpush1.bf16.msra.mxu0 %v536_v49 }
  0xcc   :  { %539 = vmatprep.subr.bf16.mxu0 %v538_v50 }
  0xcf   :  { %541 = vmatpush1.bf16.msra.mxu0 %v540_v55 }
  0xd0   :  { %543 = vmatprep.subr.bf16.mxu0 %v542_v56 }
  0xd3   :  { %545 = vmatpush1.bf16.msra.mxu0 %v544_v59 }
  0xd4   :  { %547 = vmatprep.subr.bf16.mxu0 %v546_v62 }
  0xd7   :  { %549 = vmatpush1.bf16.msra.mxu0 %v548_v2 }
  0xda   :  { %352 = vmatmul.mubr.f32.vlgmr.msra.gmra.mrb[2].mxu0 %v286_v11 }
 0x18d   :  { %v273_v12 = vpop.f32.mrb[0].mxu0 }
 0x18e   :  { %v280_v13 = vmul.f32 0.01, %v273_v12  ;;  %v275_v14 = vpop.f32.mrb[1].mxu0  ;;  %vm278_vm2 = vcmp.gt.f32.partialorder %v273_v12, 0.0 }
 0x18f   :  { %v281_v15 = vmul.f32 0.01, %v275_v14  ;;  %vm279_vm3 = vcmp.gt.f32.partialorder %v275_v14, 0.0 }
 0x190   :  { %v282_v17 = vsel %vm278_vm2, %v273_v12, %v280_v13 }
 0x191   :  { %v283_v16 = vsel %vm279_vm3, %v275_v14, %v281_v15 }
 0x192   :  { %422 = vmatprep.mubr.f32.mxu1 %v283_v16 }
 0x193   :  { %423 = vmatmul.mubr.f32.vlgmr.msra.gmra.mrb[0].mxu1 %v282_v17 }
 0x1ad   :  { %v353_v19 = vpop.f32.mrb[2].mxu0 }
 0x1ae   :  { %v355_v20 = vpop.f32.mrb[3].mxu0 }
 0x266   :  { %v424_v26 = vpop.f32.mrb[0].mxu1 }
 0x267   :  { %v425_v28 = vadd.f32 %v424_v26, %v353_v19  ;;  %v426_v29 = vpop.f32.mrb[1].mxu1 }
 0x268   :  { %v427_v30 = vadd.f32 %v426_v29, %v355_v20 }
 0x269   :  { %v440_v31 = vadd.f32 %v433_v25, %v425_v28 }
 0x26a   :  { %v441_v32 = vadd.f32 %v437_v27, %v427_v30 }
 0x26b   :  { %453 = vst [vmem:[#allocation9] sm:$0xff] %v440_v31 }
 0x26c   :  { %442 = vmax.xlane.f32.xlu0 %v441_v32 }
 0x2f9   :  { %v443_v33 = vpop.xlane.xlu0 %442 }
 0x2fa   :  { %v444_v34 = vsub.f32 %v441_v32, %v443_v33 }
 0x2fc   :  { %v445_v35 = vmul.f32 1.442695, %v444_v34 }
 0x2fe   :  { %627 = vpow2.f32 %v445_v35 }
 0x308   :  { %v628_v18 = vpop.eup %627 }
 0x309   :  { %447 = vadd.xlane.f32.xlu1 %v628_v18 }
 0x30a   :  { %708 = shalt.err (!%p705_p0)
}
 0x30b   :  { %s709_s21 = scalar_lea.hbm %s895_s7, 128 }
 0x30c   :  { %p710_p1 = scmp.ne.s32.totalorder %s895_s7, %s709_s21  ;;  %p713_p2 = scmp.lt.u32.totalorder %s709_s21, %s895_s7 }
 0x30e   :  { %p715_p3 = pnand %p713_p2, %p710_p1 }
 0x310   :  { %718 = shalt.err (!%p715_p3)
}
 0x311   :  { %473 = dma.vmem_to_hbm [thread:$0]  %s471_s18, 128, %s895_s7, [#allocation10]  }
 0x312   :  { %s758_s28 = smov [#allocation8]  }
 0x313   :  { %s460_s29 = sshll.u32 %s758_s28, 4  ;;  %s461_s29 = int_to_ptr.vmem [resolvable:$true] %s460_s29 }
 0x314   :  { %s719_s30 = scalar_lea.vmem %s461_s29, 128  ;;  %p724_p5 = scmp.lt.s32.totalorder %s461_s29, %s461_s29 }
 0x315   :  { %p720_p4 = scmp.ne.s32.totalorder %s461_s29, %s719_s30  ;;  %p725_p6 = scmp.lt.s32.totalorder %s719_s30, %s719_s30 }
 0x317   :  { %p726_p7 = por %p725_p6, %p724_p5 }
 0x319   :  { %p727_p8 = pnand %p726_p7, %p720_p4 }
 0x396   :  { %v448_v36 = vpop.xlane.xlu1 %447 }
 0x397   :  { %629 = vlog2.f32 %v448_v36 }
 0x3a1   :  { %v630_v37 = vpop.eup %629 }
 0x3a2   :  { %v450_v38 = vmul.f32 0.6931472, %v630_v37 }
 0x3a4   :  { %v451_v39 = vsub.f32 %v444_v34, %v450_v38 }
 0x3a6   :  { %452 = vst [vmem:[#allocation8] sm:$0xff] %v451_v39 }
 0x3a7   :  { %730 = shalt.err (!%p727_p8)
}
 0x3a8   :  { %s731_s7 = scalar_lea.hbm %s894_s6, 128 }
 0x3a9   :  { %p732_p9 = scmp.ne.s32.totalorder %s894_s6, %s731_s7  ;;  %p735_p10 = scmp.lt.u32.totalorder %s731_s7, %s894_s6 }
 0x3ab   :  { %p737_p11 = pnand %p735_p10, %p732_p9 }
 0x3ad   :  { %740 = shalt.err (!%p737_p11)
}
 0x3ae   :  { %463 = dma.vmem_to_hbm [thread:$0]  %s461_s29, 128, %s894_s6, [#allocation4]  }
 0x3af   :  { %745 = dma.done.wait [#allocation4], 128  }
 0x3b0   :  { %746 = vsyncadd [#allocation4], 4294967168 }
 0x3b1   :  { %747 = dma.done.wait [#allocation10], 128  }
 0x3b2   :  { %748 = vsyncadd [#allocation10], 4294967168 }
 0x3b3   :  { %480 = vsyncpa [#allocation3], 1 }
 0x3b4   :  { %481 = vsyncpa [#allocation6], 1 }
 0x3b5   :  { %482 = vsyncpa [#allocation4], 1 }
 0x3b6   :  { %483 = vsyncpa [#allocation10], 1 }

</bundles_post_ra>
